<compile_context>
chip_gen: v7x
topology: tpu7x:2x2x1
jax: 0.10.0
libtpu: 0.0.40
codegen_flags: <defaults>
</compile_context>

<pallas_src>
from collections import namedtuple

import jax
import jax.numpy as jnp
from jax.experimental import pallas as pl
from jax.experimental.pallas import tpu as pltpu


BlockArgs = namedtuple(
    "BlockArgs",
    ["kernel_size", "num_repeat", "input_filters", "output_filters",
     "expand_ratio", "id_skip", "stride", "se_ratio"])

GlobalParams = namedtuple(
    "GlobalParams",
    ["batch_norm_momentum", "batch_norm_epsilon", "dropout_rate",
     "drop_connect_rate", "num_classes", "image_size"])

# Above v5e's 16 MiB scoped default, at/below v7x's 32-of-64 MiB, far below
# v6e's 128 MiB.  TODO(synk): raise for a v6e-only build (bigger tiles).
VMEM_LIMIT = 32 * 1024 * 1024


def _same_pad(size, k, s):
    out = -(-size // s)
    pad = max((out - 1) * s + k - size, 0)
    return (pad // 2, pad - pad // 2)


def _rup(c, m=128):
    return -(-c // m) * m


def _rep_spec(shape):
    """Full-array BlockSpec broadcast to every grid step."""
    return pl.BlockSpec(tuple(shape), lambda *_, _nd=len(shape): (0,) * _nd)


def _pick_tm(m, batch, cap=512):
    """Row tile: multiple of 16 (bf16 sublanes), largest divisor <= cap, but
    split further so the grid has >= ~4 steps per TensorCore (pipeline depth)."""
    best = None
    for d in range(16, min(m, cap) + 1, 16):
        if m % d == 0:
            best = d
    if best is None:
        return m
    while best % 32 == 0 and (m // best) * batch < 8:
        best //= 2
    return best


# ----------------------------------------------------------------------------
# Generic matmul + bias + activation (used for the im2col'd stem conv).
# ----------------------------------------------------------------------------

def _mm_bias_act_kernel(act):
    def kernel(x_ref, w_ref, b_ref, o_ref):
        y = jnp.dot(x_ref[0], w_ref[...],
                    preferred_element_type=jnp.float32) + b_ref[...]
        if act == "swish":
            y = y * jax.nn.sigmoid(y)
        o_ref[0] = y.astype(o_ref.dtype)
    return kernel


def matmul_bias_act(x, w, b, act="none", out_dtype=jnp.bfloat16):
    """x: (B, M, K) bf16; w: (K, Nout) bf16 (BN scale pre-folded); b: (1, Nout)."""
    B, M, K = x.shape
    Nout = w.shape[1]
    tm = _pick_tm(M, B)
    return pl.pallas_call(
        _mm_bias_act_kernel(act),
        out_shape=jax.ShapeDtypeStruct((B, M, Nout), out_dtype),
        grid=(B, M // tm),
        in_specs=[pl.BlockSpec((1, tm, K), lambda n, m: (n, m, 0)),
                  _rep_spec(w.shape), _rep_spec(b.shape)],
        out_specs=pl.BlockSpec((1, tm, Nout), lambda n, m: (n, m, 0)),
        compiler_params=pltpu.CompilerParams(
            dimension_semantics=("parallel", "parallel"),
            vmem_limit_bytes=VMEM_LIMIT),
    )(x, w, b)


# ----------------------------------------------------------------------------
# Stem: 3x3 stride-2 SAME conv + folded BN + swish.
# im2col in the wrapper (XLA) -> single K = k*k*Cin (padded) MXU dot.
# ----------------------------------------------------------------------------

def stem_conv(x, w, b, k=3, s=2):
    """x: (N, H, W, Cin) bf16; w: (Kp, Cout_pad) bf16; b: (1, Cout_pad) f32."""
    N, H, W, Cin = x.shape
    Kp, Cout = w.shape
    Ho, Wo = -(-H // s), -(-W // s)
    ph, pw = _same_pad(H, k, s), _same_pad(W, k, s)
    need_h = (k - 1) + s * (Ho - 1) + 1
    need_w = (k - 1) + s * (Wo - 1) + 1
    xp = jnp.pad(x, ((0, 0),
                     (ph[0], max(ph[1], need_h - H - ph[0])),
                     (pw[0], max(pw[1], need_w - W - pw[0])),
                     (0, 0)))
    taps = [xp[:, kh:kh + s * (Ho - 1) + 1:s, kw:kw + s * (Wo - 1) + 1:s, :]
            for kh in range(k) for kw in range(k)]
    xcol = jnp.concatenate(taps, axis=-1).reshape(N, Ho * Wo, k * k * Cin)
    xcol = jnp.pad(xcol, ((0, 0), (0, 0), (0, Kp - k * k * Cin)))
    out = matmul_bias_act(xcol, w, b, act="swish")          # (N, Ho*Wo, Cout)
    return out.reshape(N, Ho, Wo, Cout)


# ----------------------------------------------------------------------------
# Fully fused MBConv block:
#   expand(1x1)+BN+swish -> depthwise(kxk)+BN+swish -> SE gate -> project(1x1)
#   +BN (+ residual), one kernel invocation per image.
# ----------------------------------------------------------------------------

def _mbconv_kernel(H, W, k, has_expand, has_se, has_skip):
    HW = H * W
    pad0 = (k - 1) // 2
    def kernel(*refs):
        it = iter(refs)
        x_ref = next(it)
        if has_expand:
            ew, eb = next(it), next(it)
        dw, db = next(it), next(it)
        if has_se:
            sw1, sb1, sw2, sb2 = next(it), next(it), next(it), next(it)
        pw, pb = next(it), next(it)
        o_ref = next(it)
        pad_scr = next(it)                                 # (Hp, Wp, C) f32

        C = pad_scr.shape[-1]
        x = x_ref[0]                                       # (H, W, Cin_pad) bf16

        # --- expand 1x1 + folded BN + swish, written into the zero-padded
        #     depthwise-input scratch (conv SAME padding == zeros).
        pad_scr[...] = jnp.zeros_like(pad_scr)
        if has_expand:
            xe = jnp.dot(x.reshape(HW, x.shape[-1]), ew[...],
                         preferred_element_type=jnp.float32) + eb[...]
            xe = xe * jax.nn.sigmoid(xe)
            pad_scr[pad0:pad0 + H, pad0:pad0 + W, :] = xe.reshape(H, W, C)
        else:
            pad_scr[pad0:pad0 + H, pad0:pad0 + W, :] = x.astype(jnp.float32)

        # --- depthwise kxk + folded BN + swish (VPU f32 MAC, cast-free taps).
        xp = pad_scr[...]
        acc = xp[0:H, 0:W, :] * dw[0]
        for kh in range(k):
            for kw in range(k):
                if kh == 0 and kw == 0:
                    continue
                acc = acc + xp[kh:kh + H, kw:kw + W, :] * dw[kh * k + kw]
        y = acc + db[...]
        y = y * jax.nn.sigmoid(y)
        ym = y.reshape(HW, C)                              # (HW, C) f32

        # --- squeeze-and-excitation gate, fused (tiny 1-row MXU dots).
        if has_se:
            pooled = jnp.mean(ym, axis=0, keepdims=True)   # (1, C)
            h1 = jnp.dot(pooled.astype(jnp.bfloat16), sw1[...],
                         preferred_element_type=jnp.float32) + sb1[...]
            h1 = h1 * jax.nn.sigmoid(h1)
            h2 = jnp.dot(h1.astype(jnp.bfloat16), sw2[...],
                         preferred_element_type=jnp.float32) + sb2[...]
            ym = ym * jax.nn.sigmoid(h2)                   # gate broadcast

        # --- project 1x1 + folded BN (+ identity residual).
        out = jnp.dot(ym.astype(jnp.bfloat16), pw[...],
                      preferred_element_type=jnp.float32) + pb[...]
        if has_skip:
            # TODO(synk): drop_connect is a training-time stochastic op; with
            # drop_connect_rate=0 the reference skips it -> plain residual add.
            out = out + x.reshape(HW, x.shape[-1]).astype(jnp.float32)
        o_ref[0] = out.reshape(H, W, out.shape[-1]).astype(o_ref.dtype)
    return kernel


def mbconv_block(ba, p, x):
    """One fused MBConvBlock.forward on an NHWC bf16, 128-channel-padded input."""
    N, H, W, Cin_pad = x.shape
    k = ba.kernel_size
    # TODO(synk): stride-2 depthwise conv not needed for this block config.
    assert ba.stride == 1
    has_expand = ba.expand_ratio != 1
    has_se = "se_reduce_w" in p
    has_skip = (ba.id_skip and ba.stride == 1
                and ba.input_filters == ba.output_filters)
    C = p["dw_w"].shape[-1]
    Cout_pad = p["project_w"].shape[-1]
    if not has_expand:
        assert C == Cin_pad
    Hp, Wp = H + k - 1, W + k - 1

    names = ((["expand_w", "expand_b"] if has_expand else [])
             + ["dw_w", "dw_b"]
             + (["se_reduce_w", "se_reduce_b", "se_expand_w", "se_expand_b"]
                if has_se else [])
             + ["project_w", "project_b"])
    args = [x] + [p[n] for n in names]
    specs = [pl.BlockSpec((1, H, W, Cin_pad), lambda n: (n, 0, 0, 0))]
    specs += [_rep_spec(p[n].shape) for n in names]

    # TODO(synk): for real B0 resolutions add a halo-tiled spatial grid axis so
    # the per-step working set stays inside v7x's smaller VMEM.
    return pl.pallas_call(
        _mbconv_kernel(H, W, k, has_expand, has_se, has_skip),
        out_shape=jax.ShapeDtypeStruct((N, H, W, Cout_pad), jnp.bfloat16),
        grid=(N,),
        in_specs=specs,
        out_specs=pl.BlockSpec((1, H, W, Cout_pad), lambda n: (n, 0, 0, 0)),
        scratch_shapes=[pltpu.VMEM((Hp, Wp, C), jnp.float32)],
        compiler_params=pltpu.CompilerParams(
            dimension_semantics=("parallel",),
            vmem_limit_bytes=VMEM_LIMIT),
    )(*args)


# ----------------------------------------------------------------------------
# Fused head: 1x1 conv + BN + swish -> global average pool -> FC.
# The (N, HW, 1280) head activation never leaves VMEM.
# ----------------------------------------------------------------------------

def head_gap_fc(x, head_w, head_b, fc_w, fc_b, num_classes):
    N, H, W, C = x.shape
    M = H * W
    x2 = x.reshape(N, M, C)
    tm = _pick_tm(M, N)
    inv_m = 1.0 / float(M)
    hidden = head_w.shape[1]

    def kernel(x_ref, hw_ref, hb_ref, fw_ref, fb_ref, o_ref, acc_ref):
        m = pl.program_id(1)

        @pl.when(m == 0)
        def _():
            acc_ref[...] = jnp.zeros_like(acc_ref)

        y = jnp.dot(x_ref[0], hw_ref[...],
                    preferred_element_type=jnp.float32) + hb_ref[...]
        y = y * jax.nn.sigmoid(y)                          # swish(head conv)
        acc_ref[...] += jnp.sum(y, axis=0, keepdims=True)

        @pl.when(m == pl.num_programs(1) - 1)
        def _():
            pooled = acc_ref[...] * inv_m                  # adaptive avg pool
            # TODO(synk): nn.Dropout is identity in eval mode; not implemented.
            logits = jnp.dot(pooled.astype(jnp.bfloat16), fw_ref[...],
                             preferred_element_type=jnp.float32) + fb_ref[...]
            o_ref[0] = logits

    out = pl.pallas_call(
        kernel,
        out_shape=jax.ShapeDtypeStruct((N, 1, num_classes), jnp.float32),
        grid=(N, M // tm),
        in_specs=[pl.BlockSpec((1, tm, C), lambda n, m: (n, m, 0)),
                  _rep_spec(head_w.shape), _rep_spec(head_b.shape),
                  _rep_spec(fc_w.shape), _rep_spec(fc_b.shape)],
        out_specs=pl.BlockSpec((1, 1, num_classes), lambda n, m: (n, 0, 0)),
        scratch_shapes=[pltpu.VMEM((1, hidden), jnp.float32)],
        compiler_params=pltpu.CompilerParams(
            dimension_semantics=("parallel", "arbitrary"),
            vmem_limit_bytes=VMEM_LIMIT),
    )(x2, head_w, head_b, fc_w, fc_b)
    return out.reshape(N, num_classes)


# ----------------------------------------------------------------------------
# Parameters (inference-mode folded BN; channel dims zero-padded to 128
# multiples so every HBM-facing activation is lane-dense).
# ----------------------------------------------------------------------------

def _expand_blocks_args(blocks_args):
    """Replicates the repeat-expansion in EfficientNet.__init__ (coeffs=None)."""
    expanded = []
    for ba in blocks_args:
        expanded.append(ba)
        if ba.num_repeat > 1:
            ba = ba._replace(input_filters=ba.output_filters, stride=1)
        for _ in range(ba.num_repeat - 1):
            expanded.append(ba)
    return expanded


def init_params(key, blocks_args, gp):
    keys = iter(jax.random.split(key, 512))

    def nrm(shape, std=0.1):
        return jax.random.normal(next(keys), shape, jnp.float32) * std

    def bn(c):
        gamma = jax.random.uniform(next(keys), (c,), jnp.float32, 0.5, 1.5)
        beta = nrm((c,))
        mean = nrm((c,))
        var = jax.random.uniform(next(keys), (c,), jnp.float32, 0.5, 1.5)
        # TODO(synk): BatchNorm folded in inference mode (running stats);
        # training-mode batch statistics are not implemented.
        scale = gamma / jnp.sqrt(var + gp.batch_norm_epsilon)
        return scale, beta - mean * scale

    def padw(w, rows, cols):                     # zero-pad + bf16 for the MXU
        return jnp.pad(w, ((0, rows - w.shape[0]),
                           (0, cols - w.shape[1]))).astype(jnp.bfloat16)

    def padb(b, cols):                           # biases stay f32
        return jnp.pad(b, (0, cols - b.shape[0])).reshape(1, cols)

    params = {}
    # --- stem (round_filters(32), width_coefficient=None)
    stem_out = 32
    w = nrm((3, 3, 3, stem_out))
    s, b = bn(stem_out)
    w = (w * s).reshape(27, stem_out)
    params["stem_w"] = padw(w, 32, _rup(stem_out))         # K 27->32, Cout->128
    params["stem_b"] = padb(b, _rup(stem_out))

    block_params = []
    for ba in _expand_blocks_args(blocks_args):
        inp = ba.input_filters
        oup = inp * ba.expand_ratio
        cin_p, c_p, cout_p = _rup(inp), _rup(oup), _rup(ba.output_filters)
        p = {}
        if ba.expand_ratio != 1:
            w = nrm((inp, oup)); s, b = bn(oup)
            p["expand_w"] = padw(w * s, cin_p, c_p)
            p["expand_b"] = padb(b, c_p)
        w = nrm((ba.kernel_size, ba.kernel_size, oup)); s, b = bn(oup)
        w = (w * s).reshape(ba.kernel_size * ba.kernel_size, oup)
        p["dw_w"] = jnp.pad(w, ((0, 0), (0, c_p - oup)))   # f32 for the VPU MAC
        p["dw_b"] = padb(b, c_p)
        if ba.se_ratio is not None and 0 < ba.se_ratio <= 1:
            nsq = max(1, int(inp * ba.se_ratio))
            p["se_reduce_w"] = padw(nrm((oup, nsq)), c_p, nsq)
            p["se_reduce_b"] = nrm((nsq,)).reshape(1, nsq)
            p["se_expand_w"] = padw(nrm((nsq, oup)), nsq, c_p)
            p["se_expand_b"] = padb(nrm((oup,)), c_p)
        w = nrm((oup, ba.output_filters)); s, b = bn(ba.output_filters)
        p["project_w"] = padw(w * s, c_p, cout_p)
        p["project_b"] = padb(b, cout_p)
        block_params.append((ba, p))
    params["blocks"] = block_params

    # --- head (round_filters(1280)) + FC
    head_out = 1280
    last = block_params[-1][0].output_filters
    w = nrm((last, head_out)); s, b = bn(head_out)
    params["head_w"] = padw(w * s, _rup(last), head_out)
    params["head_b"] = b.reshape(1, head_out)
    params["fc_w"] = nrm((head_out, gp.num_classes)).astype(jnp.bfloat16)
    params["fc_b"] = nrm((gp.num_classes,)).reshape(1, gp.num_classes)
    return params


# ----------------------------------------------------------------------------
# Forward pass
# ----------------------------------------------------------------------------

def efficientnet_forward(params, gp, x_nchw):
    # NCHW (PyTorch) -> NHWC (kernel layout), bf16 activations for the MXU.
    x = jnp.transpose(x_nchw, (0, 2, 3, 1)).astype(jnp.bfloat16)

    # stem: 3x3 stride-2 SAME conv + BN + swish (single im2col'd MXU dot)
    h = stem_conv(x, params["stem_w"], params["stem_b"])   # (N, Ho, Wo, 128)

    # MBConv blocks, one fused kernel each
    for ba, p in params["blocks"]:
        h = mbconv_block(ba, p, h)

    # head 1x1 conv + BN + swish + global-average-pool + FC, one fused kernel
    return head_gap_fc(h, params["head_w"], params["head_b"],
                       params["fc_w"], params["fc_b"], gp.num_classes)


# ----------------------------------------------------------------------------
# Main
# ----------------------------------------------------------------------------

if __name__ == "__main__":
    gp = GlobalParams(batch_norm_momentum=0.99, batch_norm_epsilon=1e-3,
                      dropout_rate=0.2, drop_connect_rate=0.0,
                      num_classes=10, image_size=16)
    blocks_args = [
        BlockArgs(kernel_size=3, num_repeat=1, input_filters=32,
                  output_filters=16, expand_ratio=1, id_skip=True,
                  stride=1, se_ratio=0.25),
        BlockArgs(kernel_size=3, num_repeat=2, input_filters=16,
                  output_filters=24, expand_ratio=6, id_skip=True,
                  stride=1, se_ratio=0.25),
    ]

    key = jax.random.PRNGKey(0)
    pkey, xkey = jax.random.split(key)
    params = init_params(pkey, blocks_args, gp)

    x = jax.random.normal(xkey, (2, 3, 16, 16), jnp.float32)   # NCHW like torch
    logits = efficientnet_forward(params, gp, x)
    jax.block_until_ready(logits)
    assert logits.shape == (2, gp.num_classes)
    assert bool(jnp.all(jnp.isfinite(logits)))
    print("KERNEL_OK")
</pallas_src>

<mosaic_0001>
module attributes {stable_mosaic.version = 11 : i64} {
  func.func @kernel(%arg0: i32, %arg1: i32, %arg2: memref<1x16x32xbf16, #tpu.memory_space<vmem>>, %arg3: memref<32x128xbf16, #tpu.memory_space<vmem>>, %arg4: memref<1x128xf32, #tpu.memory_space<vmem>>, %arg5: memref<1x16x128xbf16, #tpu.memory_space<vmem>>) attributes {dimension_semantics = [#tpu.dimension_semantics<parallel>, #tpu.dimension_semantics<parallel>], iteration_bounds = array<i64: 2, 4>, scalar_prefetch = 0 : i64, scratch_operands = 0 : i64, tpu.core_type = #tpu.core_type<tc>, window_params = [{transform_indices = @transform_0, window_bounds = array<i64: 1, 16, 32>}, {pipeline_mode = #tpu.pipeline_mode<synchronous>, transform_indices = @transform_1, window_bounds = array<i64: 32, 128>}, {pipeline_mode = #tpu.pipeline_mode<synchronous>, transform_indices = @transform_2, window_bounds = array<i64: 1, 128>}, {transform_indices = @transform_3, window_bounds = array<i64: 1, 16, 128>}]} {
    %c0 = arith.constant 0 : index
    %c0_0 = arith.constant 0 : index
    %c0_1 = arith.constant 0 : index
    %0 = vector.load %arg2[%c0, %c0_0, %c0_1] : memref<1x16x32xbf16, #tpu.memory_space<vmem>>, vector<1x16x32xbf16>
    %1 = vector.shape_cast %0 : vector<1x16x32xbf16> to vector<16x32xbf16>
    %c0_2 = arith.constant 0 : index
    %c0_3 = arith.constant 0 : index
    %2 = vector.load %arg3[%c0_2, %c0_3] : memref<32x128xbf16, #tpu.memory_space<vmem>>, vector<32x128xbf16>
    %cst = arith.constant dense<0.000000e+00> : vector<16x128xf32>
    %3 = tpu.matmul %1, %2, %cst {dimension_numbers = #tpu.dot_dimension_numbers<[1], [0], [0], [1], [0, 0, 1, 1], [], []>} : vector<16x32xbf16>, vector<32x128xbf16>, vector<16x128xf32> -> vector<16x128xf32>
    %c0_4 = arith.constant 0 : index
    %c0_5 = arith.constant 0 : index
    %4 = vector.load %arg4[%c0_4, %c0_5] : memref<1x128xf32, #tpu.memory_space<vmem>>, vector<1x128xf32>
    %5 = vector.broadcast %4 : vector<1x128xf32> to vector<16x128xf32>
    %6 = arith.addf %3, %5 : vector<16x128xf32>
    %7 = arith.negf %6 : vector<16x128xf32>
    %8 = math.exp %7 : vector<16x128xf32>
    %cst_6 = arith.constant 1.000000e+00 : f32
    %9 = vector.broadcast %cst_6 : f32 to vector<16x128xf32>
    %10 = arith.addf %9, %8 : vector<16x128xf32>
    %11 = arith.divf %9, %10 : vector<16x128xf32>
    %12 = arith.mulf %6, %11 : vector<16x128xf32>
    %13 = arith.truncf %12 : vector<16x128xf32> to vector<16x128xbf16>
    %c0_7 = arith.constant 0 : index
    %c0_8 = arith.constant 0 : index
    %c0_9 = arith.constant 0 : index
    %14 = vector.load %arg5[%c0_7, %c0_8, %c0_9] : memref<1x16x128xbf16, #tpu.memory_space<vmem>>, vector<1x16x128xbf16>
    %15 = vector.shape_cast %14 : vector<1x16x128xbf16> to vector<16x128xbf16>
    %16 = vector.shape_cast %13 : vector<16x128xbf16> to vector<1x16x128xbf16>
    tpu.vector_store %arg5[%c0_7, %c0_8, %c0_9], %16 {strides = array<i32>} : memref<1x16x128xbf16, #tpu.memory_space<vmem>>, vector<1x16x128xbf16>,
    return
  }
  func.func @transform_0(%arg0: i32, %arg1: i32) -> (i32, i32, i32) {
    %c0_i32 = arith.constant 0 : i32
    %c0_i32_0 = arith.constant 0 : i32
    return %arg0, %arg1, %c0_i32 : i32, i32, i32
  }
  func.func @transform_1(%arg0: i32, %arg1: i32) -> (i32, i32) {
    %c0_i32 = arith.constant 0 : i32
    %c0_i32_0 = arith.constant 0 : i32
    %c0_i32_1 = arith.constant 0 : i32
    return %c0_i32, %c0_i32_0 : i32, i32
  }
  func.func @transform_2(%arg0: i32, %arg1: i32) -> (i32, i32) {
    %c0_i32 = arith.constant 0 : i32
    %c0_i32_0 = arith.constant 0 : i32
    %c0_i32_1 = arith.constant 0 : i32
    return %c0_i32, %c0_i32_0 : i32, i32
  }
  func.func @transform_3(%arg0: i32, %arg1: i32) -> (i32, i32, i32) {
    %c0_i32 = arith.constant 0 : i32
    %c0_i32_0 = arith.constant 0 : i32
    return %arg0, %arg1, %c0_i32 : i32, i32, i32
  }
}

</mosaic_0001>

<bundles_post_ra>
// kernel: tpu_custom_call.1
= control target key start
LH: loop header
LB: loop body
LE: loop exit
PB: predicated region body
PF: predicated region fallthrough
CT: control target
= control target key end

     0   :  { %8 = vsyncpa [#allocation3], 0  ;;  %s799_s0 = inlined_call_operand.vmem [shape: bf16[2,64,32], index: 0, kind: input, shape index: {}]   ;;  %s800_s1 = inlined_call_operand.vmem [shape: bf16[32,128], index: 1, kind: input, shape index: {}]   ;;  %s801_s2 = inlined_call_operand.vmem [shape: f32[1,128], index: 2, kind: input, shape index: {}]   ;;  %s802_s3 = inlined_call_operand.hbm [shape: bf16[2,64,128], index: 3, kind: output, shape index: {}]  }
   0x1   :  { %10 = vsyncpa [#allocation3 + $0x1], 0  ;;  %s647_s12 = smov 0   ;;  %s649_s13 = smov 0  }
   0x2   :  { %s651_s14 = smov 0   ;;  %s653_s15 = smov 0  }
   0x3   :  { %s655_s16 = smov 0   ;;  %s657_s17 = smov 0  }
   0x4   :  { %s659_s18 = smov 0   ;;  %s661_s19 = smov 0  }
   0x5 LB: > { %s398_s20 = sadd.s32 4294967295, %s620_s19   ;;  %s399_s21 = sadd.s32 4294967294, %s620_s19   ;;  %s620_s19 = sphi %s661_s19, %s16_s19   ;;  %s616_s18 = sphi %s659_s18, %s811_s18   ;;  %s612_s17 = sphi %s657_s17, %s810_s17   ;;  %s608_s16 = sphi %s655_s16, %s809_s16   ;;  %s604_s15 = sphi %s653_s15, %s808_s15   ;;  %s600_s14 = sphi %s651_s14, %s807_s14   ;;  %s596_s13 = sphi %s649_s13, %s806_s13   ;;  %s592_s12 = sphi %s647_s12, %s805_s12  }
   0x6   : > { %s25_s22 = sadd.s32 1, %s612_s17  ;;  %s28_s23 = sadd.s32 1, %s616_s18 }
   0x7   : > { %p26_p0 = scmp.ge.s32.totalorder %s25_s22, 4  ;;  %p117_p1 = scmp.ne.s32.totalorder %s600_s14, %s596_s13 }
   0x8   : > { %p118_p2 = scmp.eq.s32.totalorder %s398_s20, 7  ;;  %p123_p5 = scmp.ne.s32.totalorder %s596_s13, %s592_s12 }
   0x9   : > { %s813_s22 = smov (%p26_p0, %s25_s22), 0  ;;  %s815_s23 = smov (!%p26_p0, %s28_s23), %s616_s18 }
   0xa   : > { %s103_s24 = ssub.s32 %s612_s17, %s813_s22  ;;  %p698_p3 = por %p118_p2, %p117_p1 }
   0xb   : > { %p30_p4 = scmp.ge.s32.totalorder %s815_s23, 2  ;;  %p124_p6 = scmp.eq.s32.totalorder %s399_s21, 7 }
   0xc   : > { %p402_p7 = scmp.ge.s32.totalorder %s620_s19, 1  ;;  %p161_p9 = scmp.lt.s32.totalorder %s620_s19, 9 }
   0xd   : > { %s817_s23 = smov (%p30_p4, %s815_s23), 0  ;;  %p707_p8 = por %p124_p6, %p123_p5 }
   0xe   : > { %s102_s27 = ssub.s32 %s616_s18, %s817_s23  ;;  %s107_s28 = sadd.s32 1, %s600_s14 }
   0xf   : > { %s104_s29 = sor.u32 %s103_s24, %s102_s27  ;;  %p162_p10 = pnand %p402_p7, %p161_p9 }
  0x10   : > { %p105_p11 = scmp.eq.s32.totalorder %s104_s29, 0  ;;  %v515_v0 = vld [vmem:[%s800_s1] sm:$0xff] (!%p162_p10)   ;;  %v622_v1 = vmov (!%p162_p10), 0.0   ;;  %v516_v2 = vld [vmem:[%s800_s1 + $0x8] sm:$0xff] (!%p162_p10)   ;;  %vm623_vm0 = vmmov (!%p162_p10), 0   ;;  %s725_s8 = sshll.u32 (!%p162_p10), %s604_s15, 1 }
  0x11   : > { %165 = sbr.rel (%p162_p10) target bundleno = 292 (0x124), region = 32  ;;  %432 = vmatprep.subr.bf16.mxu0 (!%p162_p10), %v622_v1  ;;  %436 = vmatprep.mubr.msk.bf16.mxu0 (!%p162_p10), %vm623_vm0, %v622_v1  ;;  %p190_p12 = scmp.lt.s32.totalorder (!%p162_p10), %s608_s16, 1  ;;  %vm231_vm1 = vcmask (!%p162_p10), 261120   ;;  %v407_v4 = vld [vmem:[%s801_s2] ss:$0 sm:$0xff] (!%p162_p10) }
  0x12   : > { %s716_s30 = scalar_select %p105_p11, %s600_s14, %s107_s28  }
  0x13   : > { %433 = vmatpush3.bf16.msra.mxu0 (!%p162_p10), %v515_v0  ;;  %p192_p13 = scmp.lt.s32.totalorder (!%p162_p10), %s725_s8, 7  ;;  %s186_s4 = sand.u32 (!%p162_p10), 1, %s596_s13  }
  0x14   : > { %434 = vmatprep.subr.bf16.mxu0 (!%p162_p10), %v622_v1  ;;  %s403_s5 = sshll.u32 (!%p162_p10), %s186_s4, 3  ;;  %s418_s6 = sshll.u32 (!%p162_p10), %s608_s16, 3 }
  0x15   : > { %s313_s7 = sadd.s32 (!%p162_p10), %s418_s6, %s725_s8  ;;  %s624_s27 = smov (!%p162_p10), [#allocation2]  }
  0x17   : > { %435 = vmatpush3.bf16.msra.mxu0 (!%p162_p10), %v516_v2 }
  0x18   : > { %s191_s9 = scalar_select %p190_p12, %s608_s16, 1 }
  0x19   : > { %s193_s10 = scalar_select %p192_p13, %s725_s8, 7 }
  0x1a   : > { %s405_s11 = sshll.u32 %s191_s9, 3  ;;  %s188_s9 = scalar_lea.vmem [#allocation2], %s403_s5 }
  0x1b   : > { %s195_s20 = sadd.s32 %s405_s11, %s193_s10  ;;  %s316_s10 = sshll.u32 %s188_s9, 4  ;;  %s745_s10 = int_to_ptr.vmem [resolvable:$true] %s316_s10 }
  0x1c   : > { %s406_s21 = sshll.u32 %s195_s20, 2  ;;  %s419_s11 = sshll.u32 %s313_s7, 6 }
  0x1d   : > { %s197_s28 = scalar_lea.vmem %s799_s0, %s406_s21  ;;  %s743_s24 = scalar_lea.hbm %s802_s3, %s419_s11 }
  0x1e   : > { %v517_v3 = vld [vmem:[%s197_s28] sm:$0xff]   ;;  %s747_s16 = scalar_lea.sflag [#allocation3], %s186_s4  ;;  %s526_s8 = scalar_lea.vmem %s745_s10, 128 }
  0x1f   : > { %437 = vmatmul.mubr.msk.bf16.vlgmr.msra.gmra.mrb[0].mxu0 %vm231_vm1, %v517_v3  ;;  %p527_p0 = scmp.ne.s32.totalorder %s745_s10, %s526_s8  ;;  %s530_s28 = sshll.u32 %s624_s27, 4  ;;  %s531_s28 = int_to_ptr.vmem [resolvable:$false] %s530_s28 }
  0x20   : > { %s532_s15 = scalar_lea.vmem %s531_s28, 256  ;;  %p533_p4 = scmp.lt.s32.totalorder %s745_s10, %s531_s28 }
  0x21   : > { %p528_p1 = pnand %p527_p0, %p698_p3  ;;  %p534_p5 = scmp.lt.s32.totalorder %s532_s15, %s526_s8 }
  0x23   : > { %p529_p2 = pneg %p528_p1  ;;  %p535_p6 = por %p534_p5, %p533_p4 }
  0x25   : > { %p536_p7 = pnand %p535_p6, %p529_p2 }
  0xf2   : > { %v269_v5 = vpop.f32.mrb[0].mxu0 }
  0xf3   : > { %v270_v6 = vadd.f32 %v407_v4, %v269_v5  ;;  %v438_v7 = vpop.f32.mrb[1].mxu0 }
  0xf4   : > { %v272_v8 = vpop.f32.mrb[2].mxu0 }
  0xf5   : > { %v412_v9 = vmul.f32 -1.442695, %v270_v6  ;;  %v273_v10 = vadd.f32 %v407_v4, %v272_v8  ;;  %v439_v11 = vpop.f32.mrb[3].mxu0 }
  0xf7   : > { %518 = vpow2.f32 %v412_v9  ;;  %v413_v12 = vmul.f32 -1.442695, %v273_v10 }
  0xf9   : > { %520 = vpow2.f32 %v413_v12 }
 0x101   : > { %v519_v13 = vpop.eup %518 }
 0x102   : > { %v282_v14 = vadd.f32 1.0, %v519_v13 }
 0x103   : > { %v521_v15 = vpop.eup %520 }
 0x104   : > { %522 = vrcp.f32 %v282_v14  ;;  %v283_v16 = vadd.f32 1.0, %v521_v15 }
 0x106   : > { %524 = vrcp.f32 %v283_v16 }
 0x10e   : > { %v523_v17 = vpop.eup %522 }
 0x10f   : > { %v288_v19 = vmul.f32 %v523_v17, %v270_v6 }
 0x110   : > { %v525_v18 = vpop.eup %524 }
 0x111   : > { %v289_v20 = vmul.f32 %v525_v18, %v273_v10 }
 0x113   : > { %v427_v21 = vpack.c.bf16 %v289_v20, %v288_v19 }
 0x115   : > { %428 = vst [vmem:[%s188_s9] sm:$0xff] %v427_v21  }
 0x116   : > { %539 = shalt.err (!%p536_p7)
}
 0x117   : > { %s540_s29 = scalar_lea.hbm %s743_s24, 128  ;;  %s544_s6 = scalar_lea.hbm %s802_s3, 1024 }
 0x118   : > { %p541_p9 = scmp.ne.s32.totalorder %s743_s24, %s540_s29  ;;  %p545_p12 = scmp.lt.u32.totalorder %s743_s24, %s802_s3 }
 0x119   : > { %p546_p13 = scmp.lt.u32.totalorder %s544_s6, %s540_s29  ;;  %p548_p1 = scmp.lt.u32.totalorder %s540_s29, %s743_s24 }
 0x11a   : > { %p542_p10 = pnand %p541_p9, %p698_p3 }
 0x11b   : > { %p547_p0 = por %p546_p13, %p545_p12 }
 0x11c   : > { %p543_p11 = pneg %p542_p10 }
 0x11d   : > { %p549_p2 = por %p548_p1, %p547_p0 }
 0x11f   : > { %p550_p4 = pnand %p549_p2, %p543_p11 }
 0x121   : > { %553 = shalt.err (!%p550_p4)
}
 0x122   : > { %s625_s11 = smov 64   ;;  %s626_s20 = smov 4  }
 0x123   : > { %440 = dma.vmem_to_hbm [thread:$0]  (%p698_p3), %s745_s10, 128, %s743_s24, %s747_s16, %s625_s11, %s625_s11, %s626_s20  }
 0x124 PF: > { %p446_p5 = scmp.ge.s32.totalorder %s620_s19, 2  ;;  %s331_s21 = sand.u32 1, %s592_s12  }
 0x125   : > { %s332_s8 = scalar_lea.sflag [#allocation3], %s331_s21 }
 0x126   : > { %p443_p6 = pnand %p446_p5, %p707_p8 }
 0x128   : > { %587 = dma.done.wait (!%p443_p6), %s332_s8, 128  }
 0x129   : > { %589 = vsyncadd (!%p443_p6), %s332_s8, 4294967168  ;;  %s16_s19 = sadd.s32 1, %s620_s19   ;;  %s805_s12 = smov %s596_s13 }
 0x12a   : > { %p13_p7 = scmp.ge.s32.totalorder %s16_s19, 10   ;;  %s806_s13 = smov %s600_s14 }
 0x12b   : > { %s807_s14 = smov %s716_s30  ;;  %s808_s15 = smov %s612_s17 }
 0x12c   : > { %s809_s16 = smov %s616_s18  ;;  %s810_s17 = smov %s813_s22 }
 0x12d   : > { %s811_s18 = smov %s817_s23  ;;  %15 = sbr.rel (!%p13_p7) target bundleno = 5 (0x5), region = 67 }
 0x134   :  { %337 = vsyncpa [#allocation3], 1 }
 0x135   :  { %339 = vsyncpa [#allocation3 + $0x1], 1 }

</bundles_post_ra>
